<compile_context>
chip_gen: v7x
topology: tpu7x:2x2x1
jax: 0.10.0
libtpu: 0.0.40
codegen_flags: <defaults>
</compile_context>

<pallas_src>
import jax
import jax.numpy as jnp
from jax.experimental import pallas as pl
from jax.experimental.pallas import tpu as pltpu


def _round_up(x, mult):
    return (x + mult - 1) // mult * mult


def mlp_kernel(z_ref,
               w1_ref, b1_ref,
               w2_ref, b2_ref,
               w3_ref, b3_ref,
               w4_ref, b4_ref,
               w5_ref, b5_ref,
               out_ref):
    """Fused 5-layer MLP forward for one (TB, F) batch tile.

    Weights/biases are VMEM-resident (constant index_map).  Each layer:
    MXU dot (f32 accumulate) -> bias add (f32, VPU) -> ReLU -> cast back to the
    MXU feed dtype for the next layer.  Last layer has no ReLU.
    """
    cdt = w1_ref.dtype  # MXU feed dtype (bf16 fast path or f32 strict path)

    h = jnp.dot(z_ref[...], w1_ref[...], preferred_element_type=jnp.float32) + b1_ref[...]
    h = jnp.maximum(h, 0.0).astype(cdt)

    h = jnp.dot(h, w2_ref[...], preferred_element_type=jnp.float32) + b2_ref[...]
    h = jnp.maximum(h, 0.0).astype(cdt)

    h = jnp.dot(h, w3_ref[...], preferred_element_type=jnp.float32) + b3_ref[...]
    h = jnp.maximum(h, 0.0).astype(cdt)

    h = jnp.dot(h, w4_ref[...], preferred_element_type=jnp.float32) + b4_ref[...]
    h = jnp.maximum(h, 0.0).astype(cdt)

    h = jnp.dot(h, w5_ref[...], preferred_element_type=jnp.float32) + b5_ref[...]

    out_ref[...] = h.astype(out_ref.dtype)


def basic_mlp_forward(z, params, *, weight_dtype=jnp.bfloat16, block_batch=256):
    """z: (B, n, n) float32.  params: list of 5 (W[in,out], b[1,out]) f32 pairs.

    Returns (B, m*m) float32.  Flatten / pad / slice is plain-JAX glue; the MLP
    itself runs as one batch-pipelined Pallas kernel with VMEM-resident weights.
    """
    B = z.shape[0]
    z_flat = z.reshape(B, -1).astype(jnp.float32)      # == torch flatten(start_dim=1)
    dim_z = z_flat.shape[1]

    dims = [dim_z] + [w.shape[1] for w, _ in params]   # [dim_z, k, k, k, j, m*m]
    pdims = [_round_up(d, 128) for d in dims]          # lane-dense feature dims
    out_dim = dims[-1]

    # Zero-pad weights/biases to lane-dense shapes; cast weights to weight_dtype,
    # keep biases f32 (bias add happens in f32 on the VPU).
    pw, pb = [], []
    for (w, b), di, do, pdi, pdo in zip(params, dims[:-1], dims[1:], pdims[:-1], pdims[1:]):
        wp = jnp.zeros((pdi, pdo), weight_dtype).at[:di, :do].set(w.astype(weight_dtype))
        bp = jnp.zeros((1, pdo), jnp.float32).at[:, :do].set(
            b.reshape(1, -1).astype(jnp.float32))
        pw.append(wp)
        pb.append(bp)

    # Batch tiling: sublane-aligned (multiple of 8), capped by block_batch.
    tb = min(block_batch, _round_up(B, 8))
    b_pad = _round_up(B, tb)
    zp = jnp.zeros((b_pad, pdims[0]), weight_dtype).at[:B, :dim_z].set(
        z_flat.astype(weight_dtype))

    grid = (b_pad // tb,)
    const_map = lambda i: (0, 0)                       # weights: same block every tile

    in_specs = [pl.BlockSpec((tb, pdims[0]), lambda i: (i, 0))]   # streamed activations
    args = [zp]
    for wp_, bp_ in zip(pw, pb):
        in_specs.append(pl.BlockSpec(wp_.shape, const_map))       # resident weight
        in_specs.append(pl.BlockSpec(bp_.shape, const_map))       # resident bias
        args += [wp_, bp_]
    out_spec = pl.BlockSpec((tb, pdims[-1]), lambda i: (i, 0))    # lane-dense output slab

    # Explicit scoped-VMEM budget: resident weights/biases + double-buffered
    # in/out tiles + in-flight intermediates, with 2x headroom; clamp to 64 MiB
    # so the same kernel fits v7x's smaller physical VMEM.
    w_bytes = sum(int(a.size) * a.dtype.itemsize for a in pw + pb)
    io_bytes = (2 * tb * pdims[0] * jnp.dtype(weight_dtype).itemsize
                + 2 * tb * pdims[-1] * 4)
    inter_bytes = 4 * tb * max(pdims) * 4
    vmem_limit = int(min(64 * 1024 * 1024,
                         max(32 * 1024 * 1024, 2 * (w_bytes + io_bytes + inter_bytes))))

    out = pl.pallas_call(
        mlp_kernel,
        out_shape=jax.ShapeDtypeStruct((b_pad, pdims[-1]), jnp.float32),
        grid=grid,
        in_specs=in_specs,
        out_specs=out_spec,
        compiler_params=pltpu.CompilerParams(
            dimension_semantics=("parallel",),   # independent batch tiles (megacore on v7x)
            vmem_limit_bytes=vmem_limit,
        ),
    )(*args)

    return out[:B, :out_dim]


def init_params(key, dim_z, m, k, j):
    """Deterministic synthetic init mirroring nn.Linear shapes (stored as W[in,out])."""
    def linear(key, fan_in, fan_out):
        kw, kb = jax.random.split(key)
        bound = 1.0 / jnp.sqrt(fan_in)
        w = jax.random.uniform(kw, (fan_in, fan_out), jnp.float32, -bound, bound)
        b = jax.random.uniform(kb, (1, fan_out), jnp.float32, -bound, bound)
        return w, b

    keys = jax.random.split(key, 5)
    dims = [(dim_z, k), (k, k), (k, k), (k, j), (j, m * m)]
    return [linear(kk, fi, fo) for kk, (fi, fo) in zip(keys, dims)]


def reference_forward(z, params):
    """Pure-JAX f32 reference (mirrors the PyTorch module)."""
    h = z.reshape(z.shape[0], -1)
    for i, (w, b) in enumerate(params):
        h = h @ w + b.reshape(1, -1)
        if i < len(params) - 1:
            h = jnp.maximum(h, 0.0)
    return h


def reference_forward_bf16(z, params):
    """Reference mirroring the kernel's bf16 weight/activation rounding with f32 accumulation."""
    h = z.reshape(z.shape[0], -1).astype(jnp.bfloat16).astype(jnp.float32)
    for i, (w, b) in enumerate(params):
        wq = w.astype(jnp.bfloat16).astype(jnp.float32)
        h = jnp.dot(h, wq, precision=jax.lax.Precision.HIGHEST) + b.reshape(1, -1)
        if i < len(params) - 1:
            h = jnp.maximum(h, 0.0).astype(jnp.bfloat16).astype(jnp.float32)
    return h


if __name__ == "__main__":
    # Small shapes consistent with the module: input (b, n, n) -> dim_z = n*n.
    B, n = 2, 8
    dim_z = n * n          # 64
    m, k, j = 4, 32, 16    # small k/j instead of defaults 1000/20

    key = jax.random.PRNGKey(0)
    kz, kp = jax.random.split(key)
    z = jax.random.normal(kz, (B, n, n), dtype=jnp.float32)
    params = init_params(kp, dim_z, m, k, j)

    # Strict-precision path (f32 weights): matches the f32 reference.
    out_f32 = jax.block_until_ready(basic_mlp_forward(z, params, weight_dtype=jnp.float32))
    ref_f32 = reference_forward(z, params)
    assert out_f32.shape == (B, m * m), out_f32.shape
    assert jnp.allclose(out_f32, ref_f32, atol=1e-4, rtol=1e-4), "f32 mismatch vs reference"

    # Fast path (bf16 weights, halves weight DMA / resident VMEM): compare against
    # a reference that applies the same bf16 rounding.
    out_bf16 = jax.block_until_ready(basic_mlp_forward(z, params, weight_dtype=jnp.bfloat16))
    ref_bf16 = reference_forward_bf16(z, params)
    assert out_bf16.shape == (B, m * m), out_bf16.shape
    assert jnp.allclose(out_bf16, ref_bf16, atol=1e-2, rtol=1e-2), "bf16 mismatch vs reference"

    print("KERNEL_OK")
</pallas_src>

<mosaic_0001>
module attributes {stable_mosaic.version = 11 : i64} {
  func.func @mlp_kernel(%arg0: i32, %arg1: memref<8x128xf32, #tpu.memory_space<vmem>>, %arg2: memref<128x128xf32, #tpu.memory_space<vmem>>, %arg3: memref<1x128xf32, #tpu.memory_space<vmem>>, %arg4: memref<128x128xf32, #tpu.memory_space<vmem>>, %arg5: memref<1x128xf32, #tpu.memory_space<vmem>>, %arg6: memref<128x128xf32, #tpu.memory_space<vmem>>, %arg7: memref<1x128xf32, #tpu.memory_space<vmem>>, %arg8: memref<128x128xf32, #tpu.memory_space<vmem>>, %arg9: memref<1x128xf32, #tpu.memory_space<vmem>>, %arg10: memref<128x128xf32, #tpu.memory_space<vmem>>, %arg11: memref<1x128xf32, #tpu.memory_space<vmem>>, %arg12: memref<8x128xf32, #tpu.memory_space<vmem>>) attributes {dimension_semantics = [#tpu.dimension_semantics<parallel>], iteration_bounds = array<i64: 1>, scalar_prefetch = 0 : i64, scratch_operands = 0 : i64, tpu.core_type = #tpu.core_type<tc>, window_params = [{transform_indices = @transform_0, window_bounds = array<i64: 8, 128>}, {pipeline_mode = #tpu.pipeline_mode<synchronous>, transform_indices = @transform_1, window_bounds = array<i64: 128, 128>}, {pipeline_mode = #tpu.pipeline_mode<synchronous>, transform_indices = @transform_2, window_bounds = array<i64: 1, 128>}, {pipeline_mode = #tpu.pipeline_mode<synchronous>, transform_indices = @transform_3, window_bounds = array<i64: 128, 128>}, {pipeline_mode = #tpu.pipeline_mode<synchronous>, transform_indices = @transform_4, window_bounds = array<i64: 1, 128>}, {pipeline_mode = #tpu.pipeline_mode<synchronous>, transform_indices = @transform_5, window_bounds = array<i64: 128, 128>}, {pipeline_mode = #tpu.pipeline_mode<synchronous>, transform_indices = @transform_6, window_bounds = array<i64: 1, 128>}, {pipeline_mode = #tpu.pipeline_mode<synchronous>, transform_indices = @transform_7, window_bounds = array<i64: 128, 128>}, {pipeline_mode = #tpu.pipeline_mode<synchronous>, transform_indices = @transform_8, window_bounds = array<i64: 1, 128>}, {pipeline_mode = #tpu.pipeline_mode<synchronous>, transform_indices = @transform_9, window_bounds = array<i64: 128, 128>}, {pipeline_mode = #tpu.pipeline_mode<synchronous>, transform_indices = @transform_10, window_bounds = array<i64: 1, 128>}, {transform_indices = @transform_11, window_bounds = array<i64: 8, 128>}]} {
    %c0 = arith.constant 0 : index
    %c0_0 = arith.constant 0 : index
    %0 = vector.load %arg1[%c0, %c0_0] : memref<8x128xf32, #tpu.memory_space<vmem>>, vector<8x128xf32>
    %c0_1 = arith.constant 0 : index
    %c0_2 = arith.constant 0 : index
    %1 = vector.load %arg2[%c0_1, %c0_2] : memref<128x128xf32, #tpu.memory_space<vmem>>, vector<128x128xf32>
    %cst = arith.constant dense<0.000000e+00> : vector<8x128xf32>
    %2 = tpu.matmul %0, %1, %cst {dimension_numbers = #tpu.dot_dimension_numbers<[1], [0], [0], [1], [0, 0, 1, 1], [], []>} : vector<8x128xf32>, vector<128x128xf32>, vector<8x128xf32> -> vector<8x128xf32>
    %c0_3 = arith.constant 0 : index
    %c0_4 = arith.constant 0 : index
    %3 = vector.load %arg3[%c0_3, %c0_4] : memref<1x128xf32, #tpu.memory_space<vmem>>, vector<1x128xf32>
    %4 = vector.broadcast %3 : vector<1x128xf32> to vector<8x128xf32>
    %5 = arith.addf %2, %4 : vector<8x128xf32>
    %cst_5 = arith.constant 0.000000e+00 : f32
    %6 = vector.broadcast %cst_5 : f32 to vector<8x128xf32>
    %7 = arith.maximumf %5, %6 : vector<8x128xf32>
    %c0_6 = arith.constant 0 : index
    %c0_7 = arith.constant 0 : index
    %8 = vector.load %arg4[%c0_6, %c0_7] : memref<128x128xf32, #tpu.memory_space<vmem>>, vector<128x128xf32>
    %cst_8 = arith.constant dense<0.000000e+00> : vector<8x128xf32>
    %9 = tpu.matmul %7, %8, %cst_8 {dimension_numbers = #tpu.dot_dimension_numbers<[1], [0], [0], [1], [0, 0, 1, 1], [], []>} : vector<8x128xf32>, vector<128x128xf32>, vector<8x128xf32> -> vector<8x128xf32>
    %c0_9 = arith.constant 0 : index
    %c0_10 = arith.constant 0 : index
    %10 = vector.load %arg5[%c0_9, %c0_10] : memref<1x128xf32, #tpu.memory_space<vmem>>, vector<1x128xf32>
    %11 = vector.broadcast %10 : vector<1x128xf32> to vector<8x128xf32>
    %12 = arith.addf %9, %11 : vector<8x128xf32>
    %cst_11 = arith.constant 0.000000e+00 : f32
    %13 = vector.broadcast %cst_11 : f32 to vector<8x128xf32>
    %14 = arith.maximumf %12, %13 : vector<8x128xf32>
    %c0_12 = arith.constant 0 : index
    %c0_13 = arith.constant 0 : index
    %15 = vector.load %arg6[%c0_12, %c0_13] : memref<128x128xf32, #tpu.memory_space<vmem>>, vector<128x128xf32>
    %cst_14 = arith.constant dense<0.000000e+00> : vector<8x128xf32>
    %16 = tpu.matmul %14, %15, %cst_14 {dimension_numbers = #tpu.dot_dimension_numbers<[1], [0], [0], [1], [0, 0, 1, 1], [], []>} : vector<8x128xf32>, vector<128x128xf32>, vector<8x128xf32> -> vector<8x128xf32>
    %c0_15 = arith.constant 0 : index
    %c0_16 = arith.constant 0 : index
    %17 = vector.load %arg7[%c0_15, %c0_16] : memref<1x128xf32, #tpu.memory_space<vmem>>, vector<1x128xf32>
    %18 = vector.broadcast %17 : vector<1x128xf32> to vector<8x128xf32>
    %19 = arith.addf %16, %18 : vector<8x128xf32>
    %cst_17 = arith.constant 0.000000e+00 : f32
    %20 = vector.broadcast %cst_17 : f32 to vector<8x128xf32>
    %21 = arith.maximumf %19, %20 : vector<8x128xf32>
    %c0_18 = arith.constant 0 : index
    %c0_19 = arith.constant 0 : index
    %22 = vector.load %arg8[%c0_18, %c0_19] : memref<128x128xf32, #tpu.memory_space<vmem>>, vector<128x128xf32>
    %cst_20 = arith.constant dense<0.000000e+00> : vector<8x128xf32>
    %23 = tpu.matmul %21, %22, %cst_20 {dimension_numbers = #tpu.dot_dimension_numbers<[1], [0], [0], [1], [0, 0, 1, 1], [], []>} : vector<8x128xf32>, vector<128x128xf32>, vector<8x128xf32> -> vector<8x128xf32>
    %c0_21 = arith.constant 0 : index
    %c0_22 = arith.constant 0 : index
    %24 = vector.load %arg9[%c0_21, %c0_22] : memref<1x128xf32, #tpu.memory_space<vmem>>, vector<1x128xf32>
    %25 = vector.broadcast %24 : vector<1x128xf32> to vector<8x128xf32>
    %26 = arith.addf %23, %25 : vector<8x128xf32>
    %cst_23 = arith.constant 0.000000e+00 : f32
    %27 = vector.broadcast %cst_23 : f32 to vector<8x128xf32>
    %28 = arith.maximumf %26, %27 : vector<8x128xf32>
    %c0_24 = arith.constant 0 : index
    %c0_25 = arith.constant 0 : index
    %29 = vector.load %arg10[%c0_24, %c0_25] : memref<128x128xf32, #tpu.memory_space<vmem>>, vector<128x128xf32>
    %cst_26 = arith.constant dense<0.000000e+00> : vector<8x128xf32>
    %30 = tpu.matmul %28, %29, %cst_26 {dimension_numbers = #tpu.dot_dimension_numbers<[1], [0], [0], [1], [0, 0, 1, 1], [], []>} : vector<8x128xf32>, vector<128x128xf32>, vector<8x128xf32> -> vector<8x128xf32>
    %c0_27 = arith.constant 0 : index
    %c0_28 = arith.constant 0 : index
    %31 = vector.load %arg11[%c0_27, %c0_28] : memref<1x128xf32, #tpu.memory_space<vmem>>, vector<1x128xf32>
    %32 = vector.broadcast %31 : vector<1x128xf32> to vector<8x128xf32>
    %33 = arith.addf %30, %32 : vector<8x128xf32>
    %c0_29 = arith.constant 0 : index
    %c0_30 = arith.constant 0 : index
    %34 = vector.load %arg12[%c0_29, %c0_30] : memref<8x128xf32, #tpu.memory_space<vmem>>, vector<8x128xf32>
    tpu.vector_store %arg12[%c0_29, %c0_30], %33 {strides = array<i32>} : memref<8x128xf32, #tpu.memory_space<vmem>>, vector<8x128xf32>,
    return
  }
  func.func @transform_0(%arg0: i32) -> (i32, i32) {
    %c0_i32 = arith.constant 0 : i32
    %c0_i32_0 = arith.constant 0 : i32
    return %arg0, %c0_i32 : i32, i32
  }
  func.func @transform_1(%arg0: i32) -> (i32, i32) {
    %c0_i32 = arith.constant 0 : i32
    %c0_i32_0 = arith.constant 0 : i32
    %c0_i32_1 = arith.constant 0 : i32
    return %c0_i32, %c0_i32_0 : i32, i32
  }
  func.func @transform_2(%arg0: i32) -> (i32, i32) {
    %c0_i32 = arith.constant 0 : i32
    %c0_i32_0 = arith.constant 0 : i32
    %c0_i32_1 = arith.constant 0 : i32
    return %c0_i32, %c0_i32_0 : i32, i32
  }
  func.func @transform_3(%arg0: i32) -> (i32, i32) {
    %c0_i32 = arith.constant 0 : i32
    %c0_i32_0 = arith.constant 0 : i32
    %c0_i32_1 = arith.constant 0 : i32
    return %c0_i32, %c0_i32_0 : i32, i32
  }
  func.func @transform_4(%arg0: i32) -> (i32, i32) {
    %c0_i32 = arith.constant 0 : i32
    %c0_i32_0 = arith.constant 0 : i32
    %c0_i32_1 = arith.constant 0 : i32
    return %c0_i32, %c0_i32_0 : i32, i32
  }
  func.func @transform_5(%arg0: i32) -> (i32, i32) {
    %c0_i32 = arith.constant 0 : i32
    %c0_i32_0 = arith.constant 0 : i32
    %c0_i32_1 = arith.constant 0 : i32
    return %c0_i32, %c0_i32_0 : i32, i32
  }
  func.func @transform_6(%arg0: i32) -> (i32, i32) {
    %c0_i32 = arith.constant 0 : i32
    %c0_i32_0 = arith.constant 0 : i32
    %c0_i32_1 = arith.constant 0 : i32
    return %c0_i32, %c0_i32_0 : i32, i32
  }
  func.func @transform_7(%arg0: i32) -> (i32, i32) {
    %c0_i32 = arith.constant 0 : i32
    %c0_i32_0 = arith.constant 0 : i32
    %c0_i32_1 = arith.constant 0 : i32
    return %c0_i32, %c0_i32_0 : i32, i32
  }
  func.func @transform_8(%arg0: i32) -> (i32, i32) {
    %c0_i32 = arith.constant 0 : i32
    %c0_i32_0 = arith.constant 0 : i32
    %c0_i32_1 = arith.constant 0 : i32
    return %c0_i32, %c0_i32_0 : i32, i32
  }
  func.func @transform_9(%arg0: i32) -> (i32, i32) {
    %c0_i32 = arith.constant 0 : i32
    %c0_i32_0 = arith.constant 0 : i32
    %c0_i32_1 = arith.constant 0 : i32
    return %c0_i32, %c0_i32_0 : i32, i32
  }
  func.func @transform_10(%arg0: i32) -> (i32, i32) {
    %c0_i32 = arith.constant 0 : i32
    %c0_i32_0 = arith.constant 0 : i32
    %c0_i32_1 = arith.constant 0 : i32
    return %c0_i32, %c0_i32_0 : i32, i32
  }
  func.func @transform_11(%arg0: i32) -> (i32, i32) {
    %c0_i32 = arith.constant 0 : i32
    %c0_i32_0 = arith.constant 0 : i32
    return %arg0, %c0_i32 : i32, i32
  }
}

</mosaic_0001>

<bundles_post_ra>
// kernel: tpu_custom_call.1
= control target key start
LH: loop header
LB: loop body
LE: loop exit
PB: predicated region body
PF: predicated region fallthrough
CT: control target
= control target key end

     0   :  { %16 = vsyncpa [#allocation3], 0  ;;  %s1405_s0 = inlined_call_operand.hbm [shape: f32[8,128], index: 0, kind: input, shape index: {}]   ;;  %s1406_s1 = inlined_call_operand.hbm [shape: f32[128,128], index: 1, kind: input, shape index: {}]   ;;  %s1407_s2 = inlined_call_operand.vmem [shape: f32[1,128], index: 2, kind: input, shape index: {}]   ;;  %s1408_s3 = inlined_call_operand.hbm [shape: f32[128,128], index: 3, kind: input, shape index: {}]   ;;  %s1409_s4 = inlined_call_operand.vmem [shape: f32[1,128], index: 4, kind: input, shape index: {}]   ;;  %s1410_s5 = inlined_call_operand.hbm [shape: f32[128,128], index: 5, kind: input, shape index: {}]   ;;  %s1411_s6 = inlined_call_operand.vmem [shape: f32[1,128], index: 6, kind: input, shape index: {}]   ;;  %s1412_s7 = inlined_call_operand.hbm [shape: f32[128,128], index: 7, kind: input, shape index: {}]   ;;  %s1413_s8 = inlined_call_operand.vmem [shape: f32[1,128], index: 8, kind: input, shape index: {}]   ;;  %s1414_s9 = inlined_call_operand.hbm [shape: f32[128,128], index: 9, kind: input, shape index: {}]   ;;  %s1415_s10 = inlined_call_operand.vmem [shape: f32[1,128], index: 10, kind: input, shape index: {}]   ;;  %s1416_s11 = inlined_call_operand.hbm [shape: f32[8,128], index: 11, kind: output, shape index: {}]  }
   0x1   :  { %17 = vsyncpa [#allocation6], 0 }
   0x2   :  { %18 = vsyncpa [#allocation9], 0 }
   0x3   :  { %19 = vsyncpa [#allocation12], 0 }
   0x4   :  { %20 = vsyncpa [#allocation4], 0  ;;  %s1169_s17 = smov [#allocation5]   ;;  %s1005_s21 = scalar_lea.hbm %s1406_s1, 2048 }
   0x5   :  { %s36_s18 = sshll.u32 %s1169_s17, 4  ;;  %p1006_p0 = scmp.ne.s32.totalorder %s1406_s1, %s1005_s21  ;;  %s37_s18 = int_to_ptr.vmem [resolvable:$true] %s36_s18 }
   0x6   :  { %p1009_p1 = scmp.lt.u32.totalorder %s1005_s21, %s1406_s1 }
   0x8   :  { %p1011_p2 = pnand %p1009_p1, %p1006_p0 }
   0xa   :  { %1014 = shalt.err (!%p1011_p2)
}
   0xb   :  { %s1015_s26 = scalar_lea.vmem %s37_s18, 2048  ;;  %p1020_p4 = scmp.lt.s32.totalorder %s37_s18, %s37_s18 }
   0xc   :  { %p1016_p3 = scmp.ne.s32.totalorder %s37_s18, %s1015_s26  ;;  %p1021_p5 = scmp.lt.s32.totalorder %s1015_s26, %s1015_s26 }
   0xe   :  { %p1022_p6 = por %p1021_p5, %p1020_p4 }
  0x10   :  { %p1023_p7 = pnand %p1022_p6, %p1016_p3 }
  0x12   :  { %1026 = shalt.err (!%p1023_p7)
}
  0x13   :  { %s1170_s27 = smov 128   ;;  %s1171_s28 = smov 8  }
  0x14   :  { %42 = dma.hbm_to_vmem [thread:$0]  %s1406_s1, 2048, %s37_s18, [#allocation6], %s1170_s27, %s1170_s27, %s1171_s28  }
  0x15   :  { %s1172_s12 = smov [#allocation8]   ;;  %s1173_s14 = smov [#allocation2]  }
  0x16   :  { %s64_s13 = sshll.u32 %s1172_s12, 4  ;;  %s27_s15 = sshll.u32 %s1173_s14, 4  ;;  %s65_s13 = int_to_ptr.vmem [resolvable:$true] %s64_s13  ;;  %s28_s15 = int_to_ptr.vmem [resolvable:$true] %s27_s15 }
  0x17   :  { %s1027_s19 = scalar_lea.hbm %s1410_s5, 2048 }
  0x18   :  { %p1028_p8 = scmp.ne.s32.totalorder %s1410_s5, %s1027_s19  ;;  %p1031_p9 = scmp.lt.u32.totalorder %s1027_s19, %s1410_s5 }
  0x1a   :  { %p1033_p10 = pnand %p1031_p9, %p1028_p8 }
  0x1c   :  { %1036 = shalt.err (!%p1033_p10)
}
  0x1d   :  { %s1037_s1 = scalar_lea.vmem %s65_s13, 2048  ;;  %p1042_p12 = scmp.lt.s32.totalorder %s65_s13, %s65_s13 }
  0x1e   :  { %p1038_p11 = scmp.ne.s32.totalorder %s65_s13, %s1037_s1  ;;  %p1043_p13 = scmp.lt.s32.totalorder %s1037_s1, %s1037_s1 }
  0x20   :  { %p1044_p0 = por %p1043_p13, %p1042_p12 }
  0x22   :  { %p1045_p1 = pnand %p1044_p0, %p1038_p11 }
  0x24   :  { %1048 = shalt.err (!%p1045_p1)
}
  0x25   :  { %70 = dma.hbm_to_vmem [thread:$0]  %s1410_s5, 2048, %s65_s13, [#allocation9], %s1170_s27, %s1170_s27, %s1171_s28  }
  0x26   :  { %s1049_s29 = scalar_lea.hbm %s1405_s0, 128 }
  0x27   :  { %p1050_p2 = scmp.ne.s32.totalorder %s1405_s0, %s1049_s29  ;;  %p1053_p3 = scmp.lt.u32.totalorder %s1049_s29, %s1405_s0 }
  0x29   :  { %p1055_p4 = pnand %p1053_p3, %p1050_p2 }
  0x2b   :  { %1058 = shalt.err (!%p1055_p4)
}
  0x2c   :  { %s1059_s17 = scalar_lea.vmem %s28_s15, 128  ;;  %p1064_p6 = scmp.lt.s32.totalorder %s28_s15, %s28_s15 }
  0x2d   :  { %p1060_p5 = scmp.ne.s32.totalorder %s28_s15, %s1059_s17  ;;  %p1065_p7 = scmp.lt.s32.totalorder %s1059_s17, %s1059_s17 }
  0x2f   :  { %p1066_p8 = por %p1065_p7, %p1064_p6 }
  0x31   :  { %p1067_p9 = pnand %p1066_p8, %p1060_p5 }
  0x33   :  { %1070 = shalt.err (!%p1067_p9)
}
  0x34   :  { %30 = dma.hbm_to_vmem [thread:$0]  %s1405_s0, 128, %s28_s15, [#allocation3]  }
  0x35   :  { %s1174_s19 = smov [#allocation7]   ;;  %s1175_s21 = smov [#allocation10]  }
  0x36   :  { %s50_s20 = sshll.u32 %s1174_s19, 4  ;;  %s78_s22 = sshll.u32 %s1175_s21, 4  ;;  %s51_s20 = int_to_ptr.vmem [resolvable:$true] %s50_s20  ;;  %s79_s22 = int_to_ptr.vmem [resolvable:$true] %s78_s22 }
  0x37   :  { %s1071_s18 = scalar_lea.hbm %s1408_s3, 2048 }
  0x38   :  { %p1072_p10 = scmp.ne.s32.totalorder %s1408_s3, %s1071_s18  ;;  %p1075_p11 = scmp.lt.u32.totalorder %s1071_s18, %s1408_s3 }
  0x3a   :  { %p1077_p12 = pnand %p1075_p11, %p1072_p10 }
  0x3c   :  { %1080 = shalt.err (!%p1077_p12)
}
  0x3d   :  { %s1081_s0 = scalar_lea.vmem %s51_s20, 2048  ;;  %p1086_p0 = scmp.lt.s32.totalorder %s51_s20, %s51_s20 }
  0x3e   :  { %p1082_p13 = scmp.ne.s32.totalorder %s51_s20, %s1081_s0  ;;  %p1087_p1 = scmp.lt.s32.totalorder %s1081_s0, %s1081_s0 }
  0x40   :  { %p1088_p2 = por %p1087_p1, %p1086_p0 }
  0x42   :  { %p1089_p3 = pnand %p1088_p2, %p1082_p13 }
  0x44   :  { %1092 = shalt.err (!%p1089_p3)
}
  0x45   :  { %56 = dma.hbm_to_vmem [thread:$0]  %s1408_s3, 2048, %s51_s20, [#allocation6], %s1170_s27, %s1170_s27, %s1171_s28  }
  0x46   :  { %s1093_s16 = scalar_lea.hbm %s1412_s7, 2048 }
  0x47   :  { %p1094_p4 = scmp.ne.s32.totalorder %s1412_s7, %s1093_s16  ;;  %p1097_p5 = scmp.lt.u32.totalorder %s1093_s16, %s1412_s7 }
  0x49   :  { %p1099_p6 = pnand %p1097_p5, %p1094_p4 }
  0x4b   :  { %1102 = shalt.err (!%p1099_p6)
}
  0x4c   :  { %s1103_s21 = scalar_lea.vmem %s79_s22, 2048  ;;  %p1108_p8 = scmp.lt.s32.totalorder %s79_s22, %s79_s22 }
  0x4d   :  { %p1104_p7 = scmp.ne.s32.totalorder %s79_s22, %s1103_s21  ;;  %p1109_p9 = scmp.lt.s32.totalorder %s1103_s21, %s1103_s21 }
  0x4f   :  { %p1110_p10 = por %p1109_p9, %p1108_p8 }
  0x51   :  { %p1111_p11 = pnand %p1110_p10, %p1104_p7 }
  0x53   :  { %1114 = shalt.err (!%p1111_p11)
}
  0x54   :  { %84 = dma.hbm_to_vmem [thread:$0]  %s1412_s7, 2048, %s79_s22, [#allocation9], %s1170_s27, %s1170_s27, %s1171_s28  }
  0x55   :  { %s1176_s23 = smov [#allocation11]   ;;  %s1115_s25 = scalar_lea.hbm %s1414_s9, 2048 }
  0x56   :  { %s92_s1 = sshll.u32 %s1176_s23, 4  ;;  %p1116_p12 = scmp.ne.s32.totalorder %s1414_s9, %s1115_s25  ;;  %s93_s1 = int_to_ptr.vmem [resolvable:$true] %s92_s1 }
  0x57   :  { %p1119_p13 = scmp.lt.u32.totalorder %s1115_s25, %s1414_s9 }
  0x59   :  { %p1121_p0 = pnand %p1119_p13, %p1116_p12 }
  0x5b   :  { %1124 = shalt.err (!%p1121_p0)
}
  0x5c   :  { %s1125_s30 = scalar_lea.vmem %s93_s1, 2048  ;;  %p1130_p2 = scmp.lt.s32.totalorder %s93_s1, %s93_s1 }
  0x5d   :  { %p1126_p1 = scmp.ne.s32.totalorder %s93_s1, %s1125_s30  ;;  %p1131_p3 = scmp.lt.s32.totalorder %s1125_s30, %s1125_s30 }
  0x5f   :  { %p1132_p4 = por %p1131_p3, %p1130_p2 }
  0x61   :  { %p1133_p5 = pnand %p1132_p4, %p1126_p1 }
  0x63   :  { %1136 = shalt.err (!%p1133_p5)
}
  0x64   :  { %98 = dma.hbm_to_vmem [thread:$0]  %s1414_s9, 2048, %s93_s1, [#allocation12], %s1170_s27, %s1170_s27, %s1171_s28  }
  0x65   :  { %1159 = dma.done.wait [#allocation3], 128  }
  0x66   :  { %1160 = vsyncadd [#allocation3], 4294967168 }
  0x67   :  { %1161 = dma.done.wait [#allocation6], 4096  }
  0x68   :  { %1162 = vsyncadd [#allocation6], 4294963200 }
  0x69   :  { %1163 = dma.done.wait [#allocation9], 4096  }
  0x6a   :  { %1164 = vsyncadd [#allocation9], 4294963200 }
  0x6b   :  { %1165 = dma.done.wait [#allocation12], 2048  }
  0x6c   :  { %1166 = vsyncadd [#allocation12], 4294965248  ;;  %v1177_v0 = vmov 0.0|0.0   ;;  %vm1178_vm0 = vmmov 0   ;;  %v1179_v1 = vmov 0.0   ;;  %v120_v2 = vld [vmem:[#allocation5] sm:$0xff] }
  0x6d   :  { %873 = vmatprep.subr.bf16.mxu0 %v1177_v0  ;;  %730 = vmatprep.mubr.msk.f32.mxu0 %vm1178_vm0, %v1179_v1  ;;  %v121_v3 = vld [vmem:[#allocation5 + $0x8] sm:$0xff]  ;;  %v122_v4 = vld [vmem:[#allocation5 + $0x10] sm:$0xff]  ;;  %v123_v6 = vld [vmem:[#allocation5 + $0x18] sm:$0xff]  ;;  %s1180_s5 = smov [#allocation13]  }
  0x6e   :  { %897 = vmatprep.subr.bf16.mxu1 %v1177_v0  ;;  %765 = vmatprep.mubr.msk.f32.mxu1 %vm1178_vm0, %v1179_v1  ;;  %v874_v5 = vpack.c.bf16 %v121_v3, %v120_v2  ;;  %v877_v7 = vpack.c.bf16 %v123_v6, %v122_v4  ;;  %v124_v8 = vld [vmem:[#allocation5 + $0x20] sm:$0xff]  ;;  %v125_v9 = vld [vmem:[#allocation5 + $0x28] sm:$0xff]  ;;  %v216_v12 = vld [vmem:[#allocation7 + $0x10] sm:$0xff]  ;;  %s596_s13 = sshll.u32 %s1180_s5, 4  ;;  %s597_s13 = int_to_ptr.vmem [resolvable:$true] %s596_s13 }
  0x6f   :  { %v214_v10 = vld [vmem:[#allocation7] sm:$0xff]  ;;  %v215_v11 = vld [vmem:[#allocation7 + $0x8] sm:$0xff]  ;;  %v217_v13 = vld [vmem:[#allocation7 + $0x18] sm:$0xff]  ;;  %v880_v14 = vpack.c.bf16 %v125_v9, %v124_v8  ;;  %s1137_s19 = scalar_lea.vmem %s597_s13, 128  ;;  %p1142_p7 = scmp.lt.s32.totalorder %s597_s13, %s597_s13 }
  0x70   :  { %875 = vmatpush3.bf16.msra.mxu0 %v874_v5  ;;  %v898_v15 = vpack.c.bf16 %v215_v11, %v214_v10  ;;  %v126_v16 = vld [vmem:[#allocation5 + $0x30] sm:$0xff]  ;;  %v127_v17 = vld [vmem:[#allocation5 + $0x38] sm:$0xff]  ;;  %v901_v18 = vpack.c.bf16 %v217_v13, %v216_v12  ;;  %v218_v19 = vld [vmem:[#allocation7 + $0x20] sm:$0xff]  ;;  %p1138_p6 = scmp.ne.s32.totalorder %s597_s13, %s1137_s19  ;;  %p1143_p8 = scmp.lt.s32.totalorder %s1137_s19, %s1137_s19 }
  0x71   :  { %876 = vmatprep.subr.bf16.mxu0 %v1177_v0  ;;  %v219_v20 = vld [vmem:[#allocation7 + $0x28] sm:$0xff]  ;;  %v883_v21 = vpack.c.bf16 %v127_v17, %v126_v16  ;;  %v128_v22 = vld [vmem:[#allocation5 + $0x40] sm:$0xff]  ;;  %v220_v25 = vld [vmem:[#allocation7 + $0x30] sm:$0xff] }
  0x72   :  { %899 = vmatpush3.bf16.msra.mxu1 %v898_v15  ;;  %v129_v23 = vld [vmem:[#allocation5 + $0x48] sm:$0xff]  ;;  %v904_v24 = vpack.c.bf16 %v219_v20, %v218_v19  ;;  %v221_v26 = vld [vmem:[#allocation7 + $0x38] sm:$0xff]  ;;  %v130_v28 = vld [vmem:[#allocation5 + $0x50] sm:$0xff]  ;;  %p1144_p9 = por %p1143_p8, %p1142_p7 }
  0x73   :  { %900 = vmatprep.subr.bf16.mxu1 %v1177_v0  ;;  %v886_v27 = vpack.c.bf16 %v129_v23, %v128_v22  ;;  %v131_v29 = vld [vmem:[#allocation5 + $0x58] sm:$0xff]  ;;  %v907_v30 = vpack.c.bf16 %v221_v26, %v220_v25  ;;  %v222_v31 = vld [vmem:[#allocation7 + $0x40] sm:$0xff]  ;;  %v223_v32 = vld [vmem:[#allocation7 + $0x48] sm:$0xff] }
  0x74   :  { %878 = vmatpush3.bf16.msra.mxu0 %v877_v7  ;;  %v889_v33 = vpack.c.bf16 %v131_v29, %v130_v28  ;;  %v132_v34 = vld [vmem:[#allocation5 + $0x60] sm:$0xff]  ;;  %v133_v35 = vld [vmem:[#allocation5 + $0x68] sm:$0xff]  ;;  %v910_v36 = vpack.c.bf16 %v223_v32, %v222_v31  ;;  %v224_v37 = vld [vmem:[#allocation7 + $0x50] sm:$0xff]  ;;  %p1145_p10 = pnand %p1144_p9, %p1138_p6 }
  0x75   :  { %879 = vmatprep.subr.bf16.mxu0 %v1177_v0  ;;  %v225_v38 = vld [vmem:[#allocation7 + $0x58] sm:$0xff]  ;;  %v892_v39 = vpack.c.bf16 %v133_v35, %v132_v34  ;;  %v134_v40 = vld [vmem:[#allocation5 + $0x70] sm:$0xff]  ;;  %v226_v43 = vld [vmem:[#allocation7 + $0x60] sm:$0xff] }
  0x76   :  { %902 = vmatpush3.bf16.msra.mxu1 %v901_v18  ;;  %v135_v41 = vld [vmem:[#allocation5 + $0x78] sm:$0xff]  ;;  %v913_v42 = vpack.c.bf16 %v225_v38, %v224_v37  ;;  %v227_v44 = vld [vmem:[#allocation7 + $0x68] sm:$0xff]  ;;  %v228_v48 = vld [vmem:[#allocation7 + $0x70] sm:$0xff] }
  0x77   :  { %903 = vmatprep.subr.bf16.mxu1 %v1177_v0  ;;  %v895_v45 = vpack.c.bf16 %v135_v41, %v134_v40  ;;  %v916_v46 = vpack.c.bf16 %v227_v44, %v226_v43  ;;  %v119_v47 = vld [vmem:[#allocation2] sm:$0xff]  ;;  %v308_v51 = vld [vmem:[#allocation8] sm:$0xff]  ;;  %v309_v52 = vld [vmem:[#allocation8 + $0x8] sm:$0xff] }
  0x78   :  { %881 = vmatpush3.bf16.msra.mxu0 %v880_v14  ;;  %v229_v49 = vld [vmem:[#allocation7 + $0x78] sm:$0xff]  ;;  %v310_v53 = vld [vmem:[#allocation8 + $0x10] sm:$0xff]  ;;  %v922_v54 = vpack.c.bf16 %v309_v52, %v308_v51  ;;  %v312_v57 = vld [vmem:[#allocation8 + $0x20] sm:$0xff] }
  0x79   :  { %882 = vmatprep.subr.bf16.mxu0 %v1177_v0  ;;  %v919_v50 = vpack.c.bf16 %v229_v49, %v228_v48  ;;  %v311_v55 = vld [vmem:[#allocation8 + $0x18] sm:$0xff]  ;;  %v313_v58 = vld [vmem:[#allocation8 + $0x28] sm:$0xff]  ;;  %v314_v60 = vld [vmem:[#allocation8 + $0x30] sm:$0xff] }
  0x7a   :  { %905 = vmatpush3.bf16.msra.mxu1 %v904_v24  ;;  %v925_v56 = vpack.c.bf16 %v311_v55, %v310_v53  ;;  %v928_v59 = vpack.c.bf16 %v313_v58, %v312_v57  ;;  %v315_v61 = vld [vmem:[#allocation8 + $0x38] sm:$0xff]  ;;  %v316_v63 = vld [vmem:[#allocation8 + $0x40] sm:$0xff]  ;;  %v317_v2 = vld [vmem:[#allocation8 + $0x48] sm:$0xff] }
  0x7b   :  { %906 = vmatprep.subr.bf16.mxu1 %v1177_v0  ;;  %v931_v62 = vpack.c.bf16 %v315_v61, %v314_v60  ;;  %v934_v3 = vpack.c.bf16 %v317_v2, %v316_v63  ;;  %v318_v4 = vld [vmem:[#allocation8 + $0x50] sm:$0xff]  ;;  %v319_v5 = vld [vmem:[#allocation8 + $0x58] sm:$0xff]  ;;  %v320_v7 = vld [vmem:[#allocation8 + $0x60] sm:$0xff] }
  0x7c   :  { %884 = vmatpush3.bf16.msra.mxu0 %v883_v21  ;;  %v937_v6 = vpack.c.bf16 %v319_v5, %v318_v4  ;;  %v321_v8 = vld [vmem:[#allocation8 + $0x68] sm:$0xff]  ;;  %v608_v10 = vld [vmem:[%s1407_s2] ss:$0 sm:$0xff]  ;;  %v322_v15 = vld [vmem:[#allocation8 + $0x70] sm:$0xff] }
  0x7d   :  { %885 = vmatprep.subr.bf16.mxu0 %v1177_v0  ;;  %v940_v9 = vpack.c.bf16 %v321_v8, %v320_v7  ;;  %v323_v16 = vld [vmem:[#allocation8 + $0x78] sm:$0xff]  ;;  %v402_v18 = vld [vmem:[#allocation10] sm:$0xff]  ;;  %v403_v19 = vld [vmem:[#allocation10 + $0x8] sm:$0xff] }
  0x7e   :  { %908 = vmatpush3.bf16.msra.mxu1 %v907_v30  ;;  %v943_v17 = vpack.c.bf16 %v323_v16, %v322_v15  ;;  %v404_v20 = vld [vmem:[#allocation10 + $0x10] sm:$0xff]  ;;  %v946_v21 = vpack.c.bf16 %v403_v19, %v402_v18  ;;  %v405_v22 = vld [vmem:[#allocation10 + $0x18] sm:$0xff]  ;;  %v406_v24 = vld [vmem:[#allocation10 + $0x20] sm:$0xff] }
  0x7f   :  { %909 = vmatprep.subr.bf16.mxu1 %v1177_v0  ;;  %v949_v23 = vpack.c.bf16 %v405_v22, %v404_v20  ;;  %v407_v25 = vld [vmem:[#allocation10 + $0x28] sm:$0xff]  ;;  %v409_v28 = vld [vmem:[#allocation10 + $0x38] sm:$0xff]  ;;  %v410_v30 = vld [vmem:[#allocation10 + $0x40] sm:$0xff] }
  0x80   :  { %887 = vmatpush3.bf16.msra.mxu0 %v886_v27  ;;  %v952_v26 = vpack.c.bf16 %v407_v25, %v406_v24  ;;  %v408_v27 = vld [vmem:[#allocation10 + $0x30] sm:$0xff]  ;;  %v411_v31 = vld [vmem:[#allocation10 + $0x48] sm:$0xff]  ;;  %v413_v34 = vld [vmem:[#allocation10 + $0x58] sm:$0xff] }
  0x81   :  { %888 = vmatprep.subr.bf16.mxu0 %v1177_v0  ;;  %v955_v29 = vpack.c.bf16 %v409_v28, %v408_v27  ;;  %v958_v32 = vpack.c.bf16 %v411_v31, %v410_v30  ;;  %v415_v37 = vld [vmem:[#allocation10 + $0x68] sm:$0xff]  ;;  %v416_v44 = vld [vmem:[#allocation10 + $0x70] sm:$0xff]  ;;  %v499_v51 = vld [vmem:[#allocation11 + $0x18] sm:$0xff] }
  0x82   :  { %911 = vmatpush3.bf16.msra.mxu1 %v910_v36  ;;  %v414_v36 = vld [vmem:[#allocation10 + $0x60] sm:$0xff]  ;;  %v497_v48 = vld [vmem:[#allocation11 + $0x8] sm:$0xff]  ;;  %v498_v49 = vld [vmem:[#allocation11 + $0x10] sm:$0xff] }
  0x83   :  { %912 = vmatprep.subr.bf16.mxu1 %v1177_v0  ;;  %v964_v38 = vpack.c.bf16 %v415_v37, %v414_v36  ;;  %v973_v52 = vpack.c.bf16 %v499_v51, %v498_v49  ;;  %v500_v53 = vld [vmem:[#allocation11 + $0x20] sm:$0xff]  ;;  %v506_v61 = vld [vmem:[#allocation11 + $0x50] sm:$0xff]  ;;  %v610_v5 = vld [vmem:[%s1411_s6] ss:$0 sm:$0xff] }
  0x84   :  { %890 = vmatpush3.bf16.msra.mxu0 %v889_v33  ;;  %v412_v33 = vld [vmem:[#allocation10 + $0x50] sm:$0xff]  ;;  %v504_v58 = vld [vmem:[#allocation11 + $0x40] sm:$0xff] }
  0x85   :  { %891 = vmatprep.subr.bf16.mxu0 %v1177_v0  ;;  %v961_v35 = vpack.c.bf16 %v413_v34, %v412_v33  ;;  %v508_v2 = vld [vmem:[#allocation11 + $0x60] sm:$0xff] }
  0x86   :  { %914 = vmatpush3.bf16.msra.mxu1 %v913_v42 }
  0x87   :  { %915 = vmatprep.subr.bf16.mxu1 %v1177_v0 }
  0x88   :  { %893 = vmatpush3.bf16.msra.mxu0 %v892_v39  ;;  %v609_v39 = vld [vmem:[%s1409_s4] ss:$0 sm:$0xff] }
  0x89   :  { %894 = vmatprep.subr.bf16.mxu0 %v1177_v0 }
  0x8a   :  { %917 = vmatpush3.bf16.msra.mxu1 %v916_v46 }
  0x8b   :  { %918 = vmatprep.subr.bf16.mxu1 %v1177_v0 }
  0x8c   :  { %896 = vmatpush3.bf16.msra.mxu0 %v895_v45  ;;  %v417_v45 = vld [vmem:[#allocation10 + $0x78] sm:$0xff] }
  0x8d   :  { %921 = vmatprep.subr.bf16.mxu0 %v1177_v0  ;;  %v967_v46 = vpack.c.bf16 %v417_v45, %v416_v44 }
  0x8e   :  { %920 = vmatpush3.bf16.msra.mxu1 %v919_v50 }
  0x8f   :  { %731 = vmatmul.mubr.f32.vlgmr.msra.gmra.mrb[0].mxu0 %v119_v47  ;;  %945 = vmatprep.subr.bf16.mxu1 %v1177_v0  ;;  %v496_v47 = vld [vmem:[#allocation11] sm:$0xff] }
  0x90   :  { %800 = vmatprep.mubr.msk.f32.mxu0 %vm1178_vm0, %v1179_v1  ;;  %923 = vmatpush3.bf16.msra.mxu0 %v922_v54  ;;  %v970_v50 = vpack.c.bf16 %v497_v48, %v496_v47  ;;  %v501_v54 = vld [vmem:[#allocation11 + $0x28] sm:$0xff] }
  0x91   :  { %924 = vmatprep.subr.bf16.mxu0 %v1177_v0  ;;  %v976_v55 = vpack.c.bf16 %v501_v54, %v500_v53 }
  0x94   :  { %926 = vmatpush3.bf16.msra.mxu0 %v925_v56  ;;  %v503_v56 = vld [vmem:[#allocation11 + $0x38] sm:$0xff] }
  0x95   :  { %927 = vmatprep.subr.bf16.mxu0 %v1177_v0 }
  0x98   :  { %929 = vmatpush3.bf16.msra.mxu0 %v928_v59  ;;  %v505_v59 = vld [vmem:[#allocation11 + $0x48] sm:$0xff] }
  0x99   :  { %930 = vmatprep.subr.bf16.mxu0 %v1177_v0  ;;  %v982_v60 = vpack.c.bf16 %v505_v59, %v504_v58 }
  0x9c   :  { %932 = vmatpush3.bf16.msra.mxu0 %v931_v62  ;;  %v507_v62 = vld [vmem:[#allocation11 + $0x58] sm:$0xff] }
  0x9d   :  { %933 = vmatprep.subr.bf16.mxu0 %v1177_v0  ;;  %v985_v63 = vpack.c.bf16 %v507_v62, %v506_v61 }
  0xa0   :  { %935 = vmatpush3.bf16.msra.mxu0 %v934_v3  ;;  %v509_v3 = vld [vmem:[#allocation11 + $0x68] sm:$0xff] }
  0xa1   :  { %936 = vmatprep.subr.bf16.mxu0 %v1177_v0  ;;  %v988_v4 = vpack.c.bf16 %v509_v3, %v508_v2 }
  0xa4   :  { %938 = vmatpush3.bf16.msra.mxu0 %v937_v6 }
  0xa5   :  { %939 = vmatprep.subr.bf16.mxu0 %v1177_v0 }
  0xa8   :  { %941 = vmatpush3.bf16.msra.mxu0 %v940_v9 }
  0xa9   :  { %942 = vmatprep.subr.bf16.mxu0 %v1177_v0 }
  0xac   :  { %944 = vmatpush3.bf16.msra.mxu0 %v943_v17  ;;  %v612_v17 = vld [vmem:[%s1415_s10] ss:$0 sm:$0xff] }
  0xad   :  { %969 = vmatprep.subr.bf16.mxu0 %v1177_v0 }
 0x162   :  { %v209_v11 = vpop.f32.mrb[0].mxu0 }
 0x163   :  { %v210_v12 = vadd.f32 %v608_v10, %v209_v11  ;;  %v732_v13 = vpop.f32.mrb[1].mxu0  ;;  %v510_v10 = vld [vmem:[#allocation11 + $0x70] sm:$0xff]  ;;  %v511_v11 = vld [vmem:[#allocation11 + $0x78] sm:$0xff] }
 0x164   :  { %v611_v13 = vld [vmem:[%s1413_s8] ss:$0 sm:$0xff] }
 0x165   :  { %v213_v14 = vmax.f32 %v210_v12, 0.0  ;;  %v991_v12 = vpack.c.bf16 %v511_v11, %v510_v10 }
 0x167   :  { %766 = vmatmul.mubr.f32.vlgmr.msra.gmra.mrb[0].mxu1 %v213_v14 }
 0x168   :  { %835 = vmatprep.mubr.msk.f32.mxu1 %vm1178_vm0, %v1179_v1  ;;  %947 = vmatpush3.bf16.msra.mxu1 %v946_v21 }
 0x169   :  { %948 = vmatprep.subr.bf16.mxu1 %v1177_v0 }
 0x16c   :  { %950 = vmatpush3.bf16.msra.mxu1 %v949_v23 }
 0x16d   :  { %951 = vmatprep.subr.bf16.mxu1 %v1177_v0 }
 0x170   :  { %953 = vmatpush3.bf16.msra.mxu1 %v952_v26 }
 0x171   :  { %954 = vmatprep.subr.bf16.mxu1 %v1177_v0 }
 0x174   :  { %956 = vmatpush3.bf16.msra.mxu1 %v955_v29 }
 0x175   :  { %957 = vmatprep.subr.bf16.mxu1 %v1177_v0 }
 0x178   :  { %959 = vmatpush3.bf16.msra.mxu1 %v958_v32 }
 0x179   :  { %960 = vmatprep.subr.bf16.mxu1 %v1177_v0 }
 0x17c   :  { %962 = vmatpush3.bf16.msra.mxu1 %v961_v35 }
 0x17d   :  { %963 = vmatprep.subr.bf16.mxu1 %v1177_v0 }
 0x180   :  { %965 = vmatpush3.bf16.msra.mxu1 %v964_v38 }
 0x181   :  { %966 = vmatprep.subr.bf16.mxu1 %v1177_v0 }
 0x184   :  { %968 = vmatpush3.bf16.msra.mxu1 %v967_v46 }
 0x23a   :  { %v303_v40 = vpop.f32.mrb[0].mxu1 }
 0x23b   :  { %v304_v41 = vadd.f32 %v609_v39, %v303_v40  ;;  %v767_v42 = vpop.f32.mrb[1].mxu1 }
 0x23d   :  { %v307_v43 = vmax.f32 %v304_v41, 0.0 }
 0x23f   :  { %801 = vmatmul.mubr.f32.vlgmr.msra.gmra.mrb[2].mxu0 %v307_v43 }
 0x240   :  { %870 = vmatprep.mubr.msk.f32.mxu0 %vm1178_vm0, %v1179_v1  ;;  %971 = vmatpush3.bf16.msra.mxu0 %v970_v50  ;;  %v502_v1 = vld [vmem:[#allocation11 + $0x30] sm:$0xff] }
 0x241   :  { %972 = vmatprep.subr.bf16.mxu0 %v1177_v0  ;;  %v979_v57 = vpack.c.bf16 %v503_v56, %v502_v1 }
 0x244   :  { %974 = vmatpush3.bf16.msra.mxu0 %v973_v52 }
 0x245   :  { %975 = vmatprep.subr.bf16.mxu0 %v1177_v0 }
 0x248   :  { %977 = vmatpush3.bf16.msra.mxu0 %v976_v55 }
 0x249   :  { %978 = vmatprep.subr.bf16.mxu0 %v1177_v0 }
 0x24c   :  { %980 = vmatpush3.bf16.msra.mxu0 %v979_v57 }
 0x24d   :  { %981 = vmatprep.subr.bf16.mxu0 %v1177_v0 }
 0x250   :  { %983 = vmatpush3.bf16.msra.mxu0 %v982_v60 }
 0x251   :  { %984 = vmatprep.subr.bf16.mxu0 %v1177_v0 }
 0x254   :  { %986 = vmatpush3.bf16.msra.mxu0 %v985_v63 }
 0x255   :  { %987 = vmatprep.subr.bf16.mxu0 %v1177_v0 }
 0x258   :  { %989 = vmatpush3.bf16.msra.mxu0 %v988_v4 }
 0x259   :  { %990 = vmatprep.subr.bf16.mxu0 %v1177_v0 }
 0x25c   :  { %992 = vmatpush3.bf16.msra.mxu0 %v991_v12 }
 0x312   :  { %v397_v6 = vpop.f32.mrb[2].mxu0 }
 0x313   :  { %v398_v7 = vadd.f32 %v610_v5, %v397_v6  ;;  %v802_v8 = vpop.f32.mrb[3].mxu0 }
 0x315   :  { %v401_v9 = vmax.f32 %v398_v7, 0.0 }
 0x317   :  { %836 = vmatmul.mubr.f32.vlgmr.msra.gmra.mrb[2].mxu1 %v401_v9 }
 0x3ea   :  { %v491_v14 = vpop.f32.mrb[2].mxu1 }
 0x3eb   :  { %v492_v15 = vadd.f32 %v611_v13, %v491_v14  ;;  %v837_v0 = vpop.f32.mrb[3].mxu1 }
 0x3ed   :  { %v495_v16 = vmax.f32 %v492_v15, 0.0 }
 0x3ef   :  { %871 = vmatmul.mubr.f32.vlgmr.msra.gmra.mrb[4].mxu0 %v495_v16 }
 0x4c2   :  { %v585_v18 = vpop.f32.mrb[4].mxu0 }
 0x4c3   :  { %v586_v19 = vadd.f32 %v612_v17, %v585_v18  ;;  %v872_v20 = vpop.f32.mrb[5].mxu0 }
 0x4c5   :  { %589 = vst [vmem:[#allocation13] sm:$0xff] %v586_v19 }
 0x4c6   :  { %1148 = shalt.err (!%p1145_p10)
}
 0x4c7   :  { %s1149_s3 = scalar_lea.hbm %s1416_s11, 128 }
 0x4c8   :  { %p1150_p11 = scmp.ne.s32.totalorder %s1416_s11, %s1149_s3  ;;  %p1153_p12 = scmp.lt.u32.totalorder %s1149_s3, %s1416_s11 }
 0x4ca   :  { %p1155_p13 = pnand %p1153_p12, %p1150_p11 }
 0x4cc   :  { %1158 = shalt.err (!%p1155_p13)
}
 0x4cd   :  { %599 = dma.vmem_to_hbm [thread:$0]  %s597_s13, 128, %s1416_s11, [#allocation4]  }
 0x4ce   :  { %1167 = dma.done.wait [#allocation4], 128  }
 0x4cf   :  { %1168 = vsyncadd [#allocation4], 4294967168 }
 0x4d0   :  { %603 = vsyncpa [#allocation3], 1 }
 0x4d1   :  { %604 = vsyncpa [#allocation6], 1 }
 0x4d2   :  { %605 = vsyncpa [#allocation9], 1 }
 0x4d3   :  { %606 = vsyncpa [#allocation12], 1 }
 0x4d4   :  { %607 = vsyncpa [#allocation4], 1 }

</bundles_post_ra>
